<compile_context>
chip_gen: v7x
topology: tpu7x:2x2x1
jax: 0.10.0
libtpu: 0.0.40
codegen_flags: <defaults>
</compile_context>

<pallas_src>
import functools

import numpy as np
import jax
import jax.numpy as jnp
from jax.experimental import pallas as pl
from jax.experimental.pallas import tpu as pltpu


# ---------------------------------------------------------------------------
# Sinusoid temporal-encoding table (identical math to the PyTorch helper).
# ---------------------------------------------------------------------------
def get_sinusoid_encoding_table(n_positions: int, d_hid: int, T: int = 1000) -> np.ndarray:
    pos = np.arange(n_positions, dtype=np.float64)[:, None]
    hid = np.arange(d_hid)[None, :]
    angle = pos / np.power(float(T), 2.0 * (hid // 2) / float(d_hid))
    table = angle.copy()
    table[:, 0::2] = np.sin(angle[:, 0::2])
    table[:, 1::2] = np.cos(angle[:, 1::2])
    return table.astype(np.float32)


def _round_up(x: int, m: int) -> int:
    return ((x + m - 1) // m) * m


# ---------------------------------------------------------------------------
# Pallas kernel: one fused (block-diag matmul + additive pe-projection) per block.
#   x_ref  : (TR, N*D)  gathered, lane-packed x rows
#   add_ref: (TR, Cp)   per-row additive term  (pe @ W + b, repeated over n, padded)
#   w_ref  : (N*D, Cp)  block-diagonal decode weight, (c, n)-ordered columns
#   o_ref  : (TR, Cp)
# ---------------------------------------------------------------------------
def _decode_kernel(x_ref, add_ref, w_ref, o_ref):
    o_ref[...] = (jnp.dot(x_ref[...], w_ref[...], preferred_element_type=jnp.float32)
                  + add_ref[...])


def decode_rows(xg_flat, add, w_bd, *, tr):
    """xg_flat: (Mp, N*D) f32; add: (Mp, Cp) f32; w_bd: (N*D, Cp) -> (Mp, Cp) f32."""
    Mp, ND = xg_flat.shape
    Cp = w_bd.shape[1]
    return pl.pallas_call(
        _decode_kernel,
        out_shape=jax.ShapeDtypeStruct((Mp, Cp), jnp.float32),
        grid=(Mp // tr,),
        in_specs=[
            pl.BlockSpec((tr, ND), lambda r: (r, 0)),   # x rows (streamed)
            pl.BlockSpec((tr, Cp), lambda r: (r, 0)),   # additive pe-projection term
            pl.BlockSpec((ND, Cp), lambda r: (0, 0)),   # constant index_map: VMEM-resident
        ],
        out_specs=pl.BlockSpec((tr, Cp), lambda r: (r, 0)),
        compiler_params=pltpu.CompilerParams(
            dimension_semantics=("parallel",)),          # rows independent -> both TCs on v7x
    )(xg_flat, add, w_bd)


# ---------------------------------------------------------------------------
# Static-shape JAX replica of the per-sample truncation + 0.75-quantile mask.
# ---------------------------------------------------------------------------
def _selection_mask(attentions, dates, threshold):
    B, L = attentions.shape
    nz = dates != 0
    has_valid = jnp.any(nz, axis=1)
    # index of the last nonzero date; EXCLUSIVE upper bound (matches the torch code).
    last = (L - 1) - jnp.argmax(nz[:, ::-1].astype(jnp.int32), axis=1)        # (B,)
    n_valid = jnp.where(has_valid, last, 0)          # all-zero-dates row selects nothing
    pos = jnp.arange(L)[None, :]
    valid = pos < n_valid[:, None]                                            # (B, L)
    vals = jnp.where(valid, attentions, jnp.inf)
    srt = jnp.sort(vals, axis=1)                                              # valid asc, inf tail
    q = jnp.float32(1.0 - threshold)
    fpos = q * jnp.maximum(n_valid.astype(jnp.float32) - 1.0, 0.0)            # torch 'linear' interp
    lo = jnp.clip(jnp.floor(fpos).astype(jnp.int32), 0, L - 1)
    hi = jnp.clip(jnp.ceil(fpos).astype(jnp.int32), 0, L - 1)
    frac = (fpos - lo.astype(jnp.float32))[:, None]
    s_lo = jnp.take_along_axis(srt, lo[:, None], axis=1)
    s_hi = jnp.take_along_axis(srt, hi[:, None], axis=1)
    quant = s_lo * (1.0 - frac) + s_hi * frac                                 # (B, 1)
    return valid & (attentions > quant)


# ---------------------------------------------------------------------------
# Module init: per-call hoist of weight/bias/pe-projection construction.
#   w: (D, C) = torch Linear weight transposed; b: (C,); pe_table: (T, D).
# ---------------------------------------------------------------------------
def init_decoder_sentinel(w, b, pe_table, n_patches):
    D, C = w.shape
    N = n_patches
    NC = N * C
    Cp = _round_up(NC, 128)
    # Block-diagonal decode weight with (c, n)-ordered columns:
    #   W_bd[n*D + d, c*N + m] = w[d, c] if n == m else 0
    # so out[:, :NC].reshape(M, C, N) needs no transpose.
    w_blk = jnp.einsum("nm,dc->ndcm", jnp.eye(N, dtype=jnp.float32), w).reshape(N * D, NC)
    w_bd = jnp.zeros((N * D, Cp), jnp.float32).at[:, :NC].set(w_blk)
    # Temporal-encoding projection folded into a lookup table: (pe @ W + b) per date.
    pe_proj_table = pe_table @ w + b[None, :]                                 # (T, C)
    return {"w_bd": w_bd, "pe_proj_table": pe_proj_table}


# ---------------------------------------------------------------------------
# Static-shape (padded) forward: no host sync inside.
# ---------------------------------------------------------------------------
@functools.partial(jax.jit, static_argnames=("threshold", "tr"))
def _forward_padded(x, attentions, dates, w_bd, pe_proj_table, *, threshold, tr):
    B, N, D = x.shape
    L = attentions.shape[1]
    C = pe_proj_table.shape[1]
    NC = N * C
    Cp = w_bd.shape[1]
    Mmax = B * L
    Mp = _round_up(Mmax, tr)

    sel = _selection_mask(attentions, dates, threshold)                       # (B, L) bool
    sel_flat = sel.reshape(Mmax)
    count = jnp.sum(sel_flat.astype(jnp.int32))                               # scalar row count

    # Compact selected flat indices to the front (stable argsort => row-major order,
    # which matches the torch cat order); pad the INDEX array, not the gathered data.
    order = jnp.argsort(jnp.logical_not(sel_flat), stable=True).astype(jnp.int32)
    order = jnp.pad(order, (0, Mp - Mmax))                                    # pad rows -> idx 0 (discarded)
    bidx = order // L
    tidx = order % L

    # Lane-dense packing of the x rows: (Mp, N*D).
    xg_flat = x.reshape(B, N * D)[bidx]
    # Single additive term per row: (pe @ W + b)[c] repeated over n -> column c*N + n.
    pe_proj = pe_proj_table[dates.reshape(-1)[order]]                         # (Mp, C)
    add = jnp.repeat(pe_proj, N, axis=1)                                      # (Mp, N*C)
    add = jnp.pad(add, ((0, 0), (0, Cp - NC)))                                # (Mp, Cp)

    out = decode_rows(xg_flat, add, w_bd, tr=tr)                              # (Mp, Cp)
    recons_p = out[:, :NC].reshape(Mp, C, N)                                  # already (c, n) ordered
    masks_p = jnp.stack([bidx, tidx], axis=1).astype(jnp.int32)               # (Mp, 2)
    return recons_p, masks_p, count


# ---------------------------------------------------------------------------
# Full forward matching DecoderSentinel.forward.
#   x: (B, N, D); attentions: (B, L); dates: (B, L) int32; params from init.
# Returns (recons (M, C, N), masks (M, 2) int32).
# ---------------------------------------------------------------------------
def decoder_sentinel_forward(x, attentions, dates, params, threshold=0.25):
    B, N, D = x.shape
    L = attentions.shape[1]
    Mmax = B * L
    # ~8 grid steps (>=2 whenever Mmax >= 16), tile a multiple of 8, capped at 512
    # so padding stays below one tile and writeback overlaps the next block.
    tr = max(8, min(512, _round_up(pl.cdiv(Mmax, 8), 8)))
    recons_p, masks_p, count = _forward_padded(
        x, attentions, dates, params["w_bd"], params["pe_proj_table"],
        threshold=float(threshold), tr=tr)
    # TODO(synk): the module's output shape is data dependent (M selected rows); one
    # scalar sync of the row count at the very end is unavoidable to build it.
    M = int(count)
    return recons_p[:M], masks_p[:M]


# ---------------------------------------------------------------------------
if __name__ == "__main__":
    B, N, D, L, C, T = 2, 8, 32, 10, 10, 24   # D=embed_dim, C=in_channels

    key = jax.random.PRNGKey(0)
    kx, ka, kd, kw, kb = jax.random.split(key, 5)

    x = jax.random.normal(kx, (B, N, D), dtype=jnp.float32)
    attentions = jax.random.uniform(ka, (B, L), dtype=jnp.float32)
    dates = jax.random.randint(kd, (B, L), 1, T).astype(jnp.int32)
    dates = dates.at[0, 8:].set(0)     # trailing zero-padding, per-sample lengths
    dates = dates.at[1, 6:].set(0)

    limit = 1.0 / np.sqrt(D)
    w = jax.random.uniform(kw, (D, C), minval=-limit, maxval=limit, dtype=jnp.float32)
    b = jax.random.uniform(kb, (C,), minval=-limit, maxval=limit, dtype=jnp.float32)

    pe_table = jnp.asarray(get_sinusoid_encoding_table(T, D, T=T))

    params = init_decoder_sentinel(w, b, pe_table, n_patches=N)   # once, at "module init"

    recons, masks = decoder_sentinel_forward(x, attentions, dates, params, threshold=0.25)
    jax.block_until_ready(recons)
    jax.block_until_ready(masks)

    # ---------------- reference checks (pure numpy) ----------------
    x_np, w_np, b_np = np.asarray(x), np.asarray(w), np.asarray(b)
    att_np = np.asarray(attentions, dtype=np.float32)
    dates_np = np.asarray(dates)
    pe_np = np.asarray(pe_table)

    # selection reference (mirrors torch: exclusive last-nonzero bound,
    # 'linear' quantile interpolation, strict '>')
    ref_pairs = []
    for i in range(B):
        last = int(np.nonzero(dates_np[i] != 0)[0][-1])
        att_i = att_np[i, :last]
        srt = np.sort(att_i)
        fpos = np.float32(1.0 - 0.25) * np.float32(last - 1)
        lo, hi = int(np.floor(fpos)), int(np.ceil(fpos))
        fr = np.float32(fpos) - np.float32(lo)
        quant = srt[lo] * (np.float32(1.0) - fr) + srt[hi] * fr
        for p in np.nonzero(att_i > quant)[0]:
            ref_pairs.append((i, int(p)))
    ref_masks = np.asarray(ref_pairs, dtype=np.int32).reshape(-1, 2)

    masks_np = np.asarray(masks)
    np.testing.assert_array_equal(masks_np, ref_masks)
    assert masks.dtype == jnp.int32 and masks_np.shape[1] == 2

    # hot-path reference: per selected (i, p): ((x[i] + pe[date]) @ W + b).T -> (C, N)
    ref = np.stack(
        [((x_np[i] + pe_np[int(dates_np[i, p])][None, :]) @ w_np + b_np).T
         for (i, p) in ref_pairs], axis=0)                                   # (M, C, N)
    np.testing.assert_allclose(np.asarray(recons), ref, rtol=1e-5, atol=3e-5)

    print("KERNEL_OK")
</pallas_src>

<mosaic_0001>
module attributes {stable_mosaic.version = 11 : i64} {
  func.func @_decode_kernel(%arg0: i32, %arg1: memref<8x256xf32, #tpu.memory_space<vmem>>, %arg2: memref<8x128xf32, #tpu.memory_space<vmem>>, %arg3: memref<256x128xf32, #tpu.memory_space<vmem>>, %arg4: memref<8x128xf32, #tpu.memory_space<vmem>>) attributes {dimension_semantics = [#tpu.dimension_semantics<parallel>], iteration_bounds = array<i64: 3>, scalar_prefetch = 0 : i64, scratch_operands = 0 : i64, tpu.core_type = #tpu.core_type<tc>, window_params = [{transform_indices = @transform_0, window_bounds = array<i64: 8, 256>}, {transform_indices = @transform_1, window_bounds = array<i64: 8, 128>}, {pipeline_mode = #tpu.pipeline_mode<synchronous>, transform_indices = @transform_2, window_bounds = array<i64: 256, 128>}, {transform_indices = @transform_3, window_bounds = array<i64: 8, 128>}]} {
    %c0 = arith.constant 0 : index
    %c0_0 = arith.constant 0 : index
    %0 = vector.load %arg1[%c0, %c0_0] : memref<8x256xf32, #tpu.memory_space<vmem>>, vector<8x256xf32>
    %c0_1 = arith.constant 0 : index
    %c0_2 = arith.constant 0 : index
    %1 = vector.load %arg3[%c0_1, %c0_2] : memref<256x128xf32, #tpu.memory_space<vmem>>, vector<256x128xf32>
    %cst = arith.constant dense<0.000000e+00> : vector<8x128xf32>
    %2 = tpu.matmul %0, %1, %cst {dimension_numbers = #tpu.dot_dimension_numbers<[1], [0], [0], [1], [0, 0, 1, 1], [], []>} : vector<8x256xf32>, vector<256x128xf32>, vector<8x128xf32> -> vector<8x128xf32>
    %c0_3 = arith.constant 0 : index
    %c0_4 = arith.constant 0 : index
    %3 = vector.load %arg2[%c0_3, %c0_4] : memref<8x128xf32, #tpu.memory_space<vmem>>, vector<8x128xf32>
    %4 = arith.addf %2, %3 : vector<8x128xf32>
    %c0_5 = arith.constant 0 : index
    %c0_6 = arith.constant 0 : index
    %5 = vector.load %arg4[%c0_5, %c0_6] : memref<8x128xf32, #tpu.memory_space<vmem>>, vector<8x128xf32>
    tpu.vector_store %arg4[%c0_5, %c0_6], %4 {strides = array<i32>} : memref<8x128xf32, #tpu.memory_space<vmem>>, vector<8x128xf32>,
    return
  }
  func.func @transform_0(%arg0: i32) -> (i32, i32) {
    %c0_i32 = arith.constant 0 : i32
    %c0_i32_0 = arith.constant 0 : i32
    return %arg0, %c0_i32 : i32, i32
  }
  func.func @transform_1(%arg0: i32) -> (i32, i32) {
    %c0_i32 = arith.constant 0 : i32
    %c0_i32_0 = arith.constant 0 : i32
    return %arg0, %c0_i32 : i32, i32
  }
  func.func @transform_2(%arg0: i32) -> (i32, i32) {
    %c0_i32 = arith.constant 0 : i32
    %c0_i32_0 = arith.constant 0 : i32
    %c0_i32_1 = arith.constant 0 : i32
    return %c0_i32, %c0_i32_0 : i32, i32
  }
  func.func @transform_3(%arg0: i32) -> (i32, i32) {
    %c0_i32 = arith.constant 0 : i32
    %c0_i32_0 = arith.constant 0 : i32
    return %arg0, %c0_i32 : i32, i32
  }
}

</mosaic_0001>

<bundles_post_ra>
// kernel: _forward_padded.1
= control target key start
LH: loop header
LB: loop body
LE: loop exit
PB: predicated region body
PF: predicated region fallthrough
CT: control target
= control target key end

     0   :  { %s472_s12 = smov 0   ;;  %s596_s0 = inlined_call_operand.vmem [shape: f32[24,256], index: 0, kind: input, shape index: {}]   ;;  %s597_s1 = inlined_call_operand.vmem [shape: f32[24,128], index: 1, kind: input, shape index: {}]   ;;  %s598_s2 = inlined_call_operand.vmem [shape: f32[256,128], index: 2, kind: input, shape index: {}]   ;;  %s599_s3 = inlined_call_operand.vmem [shape: f32[24,128], index: 3, kind: output, shape index: {}]  }
   0x1 LB: > { %s357_s13 = sadd.s32 4294967295, %s450_s12   ;;  %p361_p0 = scmp.ge.s32.totalorder %s450_s12, 1  ;;  %s450_s12 = sphi %s472_s12, %s13_s12  }
   0x2   : > { %p146_p1 = scmp.lt.s32.totalorder %s450_s12, 4 }
   0x4   : > { %p147_p2 = pnand %p361_p0, %p146_p1 }
   0x5   : > { %v204_v0 = vld [vmem:[%s598_s2 + $0x80] sm:$0xff] (!%p147_p2)  ;;  %v205_v1 = vld [vmem:[%s598_s2 + $0x88] sm:$0xff] (!%p147_p2)  ;;  %p173_p3 = scmp.lt.s32.totalorder (!%p147_p2), %s357_s13, 2  ;;  %v206_v5 = vld [vmem:[%s598_s2 + $0x90] sm:$0xff] (!%p147_p2) }
   0x6   : > { %150 = sbr.rel (%p147_p2) target bundleno = 258 (0x102), region = 32  ;;  %v188_v2 = vld [vmem:[%s598_s2] sm:$0xff] (!%p147_p2)  ;;  %v404_v3 = vpack.c.bf16 (!%p147_p2), %v205_v1, %v204_v0  ;;  %v189_v4 = vld [vmem:[%s598_s2 + $0x8] sm:$0xff] (!%p147_p2)  ;;  %v207_v6 = vld [vmem:[%s598_s2 + $0x98] sm:$0xff] (!%p147_p2) }
   0x7   : > { %v406_v7 = vpack.c.bf16 (!%p147_p2), %v189_v4, %v188_v2  ;;  %v408_v8 = vpack.c.bf16 (!%p147_p2), %v207_v6, %v206_v5  ;;  %v190_v9 = vld [vmem:[%s598_s2 + $0x10] sm:$0xff] (!%p147_p2)  ;;  %v191_v10 = vld [vmem:[%s598_s2 + $0x18] sm:$0xff] (!%p147_p2)  ;;  %v208_v11 = vld [vmem:[%s598_s2 + $0xa0] sm:$0xff] (!%p147_p2) }
   0x8   : > { %405 = vmatprep.subr.bf16.mxu0 (!%p147_p2), %v404_v3  ;;  %v209_v12 = vld [vmem:[%s598_s2 + $0xa8] sm:$0xff] (!%p147_p2)  ;;  %v410_v13 = vpack.c.bf16 (!%p147_p2), %v191_v10, %v190_v9  ;;  %v192_v15 = vld [vmem:[%s598_s2 + $0x20] sm:$0xff] (!%p147_p2)  ;;  %v210_v17 = vld [vmem:[%s598_s2 + $0xb0] sm:$0xff] (!%p147_p2) }
   0x9   : > { %407 = vmatpush3.bf16.msra.mxu0 (!%p147_p2), %v406_v7  ;;  %v412_v14 = vpack.c.bf16 (!%p147_p2), %v209_v12, %v208_v11  ;;  %v193_v16 = vld [vmem:[%s598_s2 + $0x28] sm:$0xff] (!%p147_p2)  ;;  %v211_v18 = vld [vmem:[%s598_s2 + $0xb8] sm:$0xff] (!%p147_p2)  ;;  %v194_v21 = vld [vmem:[%s598_s2 + $0x30] sm:$0xff] (!%p147_p2) }
   0xa   : > { %409 = vmatprep.subr.bf16.mxu0 (!%p147_p2), %v408_v8  ;;  %v414_v19 = vpack.c.bf16 (!%p147_p2), %v193_v16, %v192_v15  ;;  %v416_v20 = vpack.c.bf16 (!%p147_p2), %v211_v18, %v210_v17  ;;  %v195_v22 = vld [vmem:[%s598_s2 + $0x38] sm:$0xff] (!%p147_p2)  ;;  %v212_v23 = vld [vmem:[%s598_s2 + $0xc0] sm:$0xff] (!%p147_p2)  ;;  %v213_v24 = vld [vmem:[%s598_s2 + $0xc8] sm:$0xff] (!%p147_p2) }
   0xb   : > { %v418_v26 = vpack.c.bf16 (!%p147_p2), %v195_v22, %v194_v21  ;;  %v420_v27 = vpack.c.bf16 (!%p147_p2), %v213_v24, %v212_v23  ;;  %v196_v28 = vld [vmem:[%s598_s2 + $0x40] sm:$0xff] (!%p147_p2)  ;;  %v197_v29 = vld [vmem:[%s598_s2 + $0x48] sm:$0xff] (!%p147_p2)  ;;  %v214_v30 = vld [vmem:[%s598_s2 + $0xd0] sm:$0xff] (!%p147_p2) }
   0xc   : > { %v215_v31 = vld [vmem:[%s598_s2 + $0xd8] sm:$0xff] (!%p147_p2)  ;;  %v422_v32 = vpack.c.bf16 (!%p147_p2), %v197_v29, %v196_v28  ;;  %v198_v34 = vld [vmem:[%s598_s2 + $0x50] sm:$0xff] (!%p147_p2)  ;;  %v216_v36 = vld [vmem:[%s598_s2 + $0xe0] sm:$0xff] (!%p147_p2) }
   0xd   : > { %s601_s13 = smov (!%p173_p3, %s357_s13), 2  ;;  %411 = vmatpush3.bf16.msra.mxu0 %v410_v13  ;;  %v424_v33 = vpack.c.bf16 %v215_v31, %v214_v30  ;;  %v199_v35 = vld [vmem:[%s598_s2 + $0x58] sm:$0xff]  ;;  %v217_v37 = vld [vmem:[%s598_s2 + $0xe8] sm:$0xff]  ;;  %v200_v40 = vld [vmem:[%s598_s2 + $0x60] sm:$0xff] }
   0xe   : > { %s368_s7 = sshll.u32 %s601_s13, 4  ;;  %413 = vmatprep.subr.bf16.mxu0 %v412_v14  ;;  %v426_v38 = vpack.c.bf16 %v199_v35, %v198_v34  ;;  %v428_v39 = vpack.c.bf16 %v217_v37, %v216_v36  ;;  %v201_v41 = vld [vmem:[%s598_s2 + $0x68] sm:$0xff]  ;;  %v218_v42 = vld [vmem:[%s598_s2 + $0xf0] sm:$0xff]  ;;  %v219_v43 = vld [vmem:[%s598_s2 + $0xf8] sm:$0xff]  ;;  %s364_s6 = sshll.u32 %s601_s13, 3 }
   0xf   : > { %s528_s20 = scalar_lea.vmem %s596_s0, %s368_s7  ;;  %v430_v44 = vpack.c.bf16 %v201_v41, %v200_v40  ;;  %v432_v45 = vpack.c.bf16 %v219_v43, %v218_v42  ;;  %v202_v46 = vld [vmem:[%s598_s2 + $0x70] sm:$0xff]  ;;  %v203_v47 = vld [vmem:[%s598_s2 + $0x78] sm:$0xff]  ;;  %s181_s9 = scalar_lea.vmem %s597_s1, %s364_s6 }
  0x10   : > { %v187_v25 = vld [vmem:[%s528_s20 + $0x8] sm:$0xff]  ;;  %v434_v48 = vpack.c.bf16 %v203_v47, %v202_v46  ;;  %v186_v49 = vld [vmem:[%s528_s20] sm:$0xff]  ;;  %s185_s14 = scalar_lea.vmem %s599_s3, %s364_s6 }
  0x11   : > { %285 = vmatprep.mubr.f32.mxu0 %v187_v25  ;;  %415 = vmatpush3.bf16.msra.mxu0 %v414_v19  ;;  %v220_v51 = vld [vmem:[%s181_s9] sm:$0xff] }
  0x12   : > { %417 = vmatprep.subr.bf16.mxu0 %v416_v20 }
  0x15   : > { %419 = vmatpush3.bf16.msra.mxu0 %v418_v26 }
  0x16   : > { %421 = vmatprep.subr.bf16.mxu0 %v420_v27 }
  0x19   : > { %423 = vmatpush3.bf16.msra.mxu0 %v422_v32 }
  0x1a   : > { %425 = vmatprep.subr.bf16.mxu0 %v424_v33 }
  0x1d   : > { %427 = vmatpush3.bf16.msra.mxu0 %v426_v38 }
  0x1e   : > { %429 = vmatprep.subr.bf16.mxu0 %v428_v39 }
  0x21   : > { %431 = vmatpush3.bf16.msra.mxu0 %v430_v44 }
  0x22   : > { %433 = vmatprep.subr.bf16.mxu0 %v432_v45 }
  0x25   : > { %435 = vmatpush3.bf16.msra.mxu0 %v434_v48 }
  0x28   : > { %286 = vmatmul.mubr.f32.vlgmr.msra.gmra.mrb[0].mxu0 %v186_v49 }
  0xfb   : > { %v401_v50 = vpop.f32.mrb[0].mxu0 }
  0xfc   : > { %v402_v52 = vpop.f32.mrb[1].mxu0 }
  0xfd   : > { %v403_v53 = vadd.f32 %v402_v52, %v401_v50 }
  0xff   : > { %v288_v54 = vadd.f32 %v403_v53, %v220_v51 }
 0x101   : > { %291 = vst [vmem:[%s185_s14] sm:$0xff] %v288_v54 }
 0x102 PF: > { %s13_s12 = sadd.s32 1, %s450_s12  }
 0x103   : > { %p10_p4 = scmp.ge.s32.totalorder %s13_s12, 5  }
 0x105   :  { %12 = sbr.rel (!%p10_p4) target bundleno = 1 (0x1), region = 65 }

</bundles_post_ra>
